<compile_context>
chip_gen: v6e
topology: v6e:2x2x1
jax: 0.10.0
libtpu: 0.0.40
codegen_flags: <defaults>
</compile_context>

<pallas_src>
import jax
import jax.numpy as jnp
from jax.experimental import pallas as pl
from jax.experimental.pallas import tpu as pltpu


def _identity_kernel(x_ref, o_ref):
    # Pure pass-through: load the current VMEM tile and store it unchanged.
    o_ref[...] = x_ref[...]


def _pallas_identity_2d(x2d, max_block_rows=512, max_block_cols=512):
    """Identity copy of a 2-D array via a tiled, aliased pallas_call."""
    rows, cols = x2d.shape

    if rows % 8 == 0 and cols % 128 == 0:
        # Tileable layout: pick the largest block that stays well under the
        # scoped VMEM limit (512x512 f32 = 1 MiB/block; ~4 MiB double-buffered).
        br = min(rows, max_block_rows)
        bc = min(cols, max_block_cols)
    else:
        # Full-array block is always legal regardless of (8, 128) alignment.
        br, bc = rows, cols

    grid = (pl.cdiv(rows, br), pl.cdiv(cols, bc))

    return pl.pallas_call(
        _identity_kernel,
        out_shape=jax.ShapeDtypeStruct((rows, cols), x2d.dtype),
        grid_spec=pltpu.PrefetchScalarGridSpec(
            num_scalar_prefetch=0,
            grid=grid,
            in_specs=[pl.BlockSpec((br, bc), lambda i, j: (i, j))],
            out_specs=pl.BlockSpec((br, bc), lambda i, j: (i, j)),
        ),
        # Identity: let the output alias the input buffer — no extra
        # output allocation / HBM traffic for the result slab.
        input_output_aliases={0: 0},
        compiler_params=pltpu.CompilerParams(
            dimension_semantics=("parallel", "parallel"),
        ),
    )(x2d)


def _lane_dense_layout(total, fallback_rows):
    """Widest lane extent whose row count stays sublane-aligned."""
    for c in (1024, 512, 256, 128):
        if total % c == 0 and (total // c) % 8 == 0:
            return (total // c, c)
    # Fallback: 2-D with the leading dim first; handled as a single
    # full-array block inside _pallas_identity_2d.
    return (fallback_rows, total // fallback_rows)


@jax.jit
def _custom_module_identity(x):
    """Zero-compute Pallas pass-through of x (exercises the kernel path)."""
    total = x.size
    rows, cols = _lane_dense_layout(total, x.shape[0])
    flat = x.reshape(rows, cols)          # pure layout plumbing, no padding
    copied = _pallas_identity_2d(flat)
    return copied.reshape(x.shape)


def custom_module_forward(x):
    """JAX/Pallas equivalent of CustomModule.forward.

    The PyTorch module has no parameters and its forward body is `pass`, so
    the true output is None. We dispatch the zero-compute identity kernel
    asynchronously (no host sync here) and return None to match the
    reference semantics exactly.
    """
    _ = _custom_module_identity(x)
    return None


if __name__ == "__main__":
    key = jax.random.PRNGKey(0)
    # Small CIFAR-like input: batch=2, channels=4, spatial=16x16, NCHW.
    x = jax.random.normal(key, (2, 4, 16, 16), dtype=jnp.float32)

    # Exercise + verify the Pallas identity kernel directly.
    roundtrip = _custom_module_identity(x)
    jax.block_until_ready(roundtrip)
    assert roundtrip.shape == x.shape
    assert bool(jnp.allclose(roundtrip, x))

    # The module's forward itself returns None (reference semantics).
    out = custom_module_forward(x)
    assert out is None

    print("KERNEL_OK")
</pallas_src>

<mosaic_0001>
module attributes {stable_mosaic.version = 11 : i64} {
  func.func @_identity_kernel(%arg0: i32, %arg1: i32, %arg2: memref<8x256xf32, #tpu.memory_space<vmem>>, %arg3: memref<8x256xf32, #tpu.memory_space<vmem>>) attributes {dimension_semantics = [#tpu.dimension_semantics<parallel>, #tpu.dimension_semantics<parallel>], iteration_bounds = array<i64: 1, 1>, scalar_prefetch = 0 : i64, scratch_operands = 0 : i64, tpu.core_type = #tpu.core_type<tc>, window_params = [{transform_indices = @transform_0, window_bounds = array<i64: 8, 256>}, {transform_indices = @transform_1, window_bounds = array<i64: 8, 256>}]} {
    %c0 = arith.constant 0 : index
    %c0_0 = arith.constant 0 : index
    %0 = vector.load %arg2[%c0, %c0_0] : memref<8x256xf32, #tpu.memory_space<vmem>>, vector<8x256xf32>
    %c0_1 = arith.constant 0 : index
    %c0_2 = arith.constant 0 : index
    %1 = vector.load %arg3[%c0_1, %c0_2] : memref<8x256xf32, #tpu.memory_space<vmem>>, vector<8x256xf32>
    tpu.vector_store %arg3[%c0_1, %c0_2], %0 {strides = array<i32>} : memref<8x256xf32, #tpu.memory_space<vmem>>, vector<8x256xf32>,
    return
  }
  func.func @transform_0(%arg0: i32, %arg1: i32) -> (i32, i32) {
    %c0_i32 = arith.constant 0 : i32
    return %arg0, %arg1 : i32, i32
  }
  func.func @transform_1(%arg0: i32, %arg1: i32) -> (i32, i32) {
    %c0_i32 = arith.constant 0 : i32
    return %arg0, %arg1 : i32, i32
  }
}

</mosaic_0001>

<bundles_post_ra>
// kernel: _custom_module_identity.1
= control target key start
LH: loop header
LB: loop body
LE: loop exit
PB: predicated region body
PF: predicated region fallthrough
CT: control target
= control target key end

     0   :  { %s38_s0 = inlined_call_operand.vmem [shape: f32[8,256], index: 0, kind: input, shape index: {}, may-alias: {0,1}]   ;;  %s39_s1 = inlined_call_operand.vmem [shape: f32[8,256], index: 1, kind: output, shape index: {}, may-alias: {0,1}]  }
   0x1   :  { %v8_v0 = vld [vmem:[%s38_s0] sm:$0xff]  ;;  %v9_v1 = vld [vmem:[%s38_s0 + $0x8] sm:$0xff] }
   0x2   :  { %10 = vst [vmem:[%s39_s1] sm:$0xff] %v8_v0  ;;  %11 = vst [vmem:[%s39_s1 + $0x8] sm:$0xff] %v9_v1 }

</bundles_post_ra>
